<compile_context>
chip_gen: v6e
topology: v6e:2x2x1
jax: 0.10.0
libtpu: 0.0.40
codegen_flags: <defaults>
</compile_context>

<pallas_src>
import math

import jax
import jax.numpy as jnp
from jax import lax
from jax.experimental import pallas as pl
from jax.experimental.pallas import tpu as pltpu


_TARGET_BLOCK_BYTES = 2 << 20   # ~2 MiB x blocks (measured ~85% of f32-add roofline at 1-4 MiB)
_MIN_BLOCK_BYTES = 1 << 20      # don't shrink below ~1 MiB just to add grid steps
_SMALL_BLOCK_BYTES = 256 << 10  # ...but allow ~256 KiB blocks to reach >= 2 steps (v7x: 2 TCs)
_MIN_GRID_STEPS = 8             # >= 4 steps per TensorCore on v7x whenever S allows
_SIN_MIN_B = 4                  # B >= 4: in-kernel sin amortized by 1/B beats streaming the PE table
_VMEM_BUDGET = 48 << 20         # live double-buffered bytes cap (v7x has 64 MiB/TC)


def _cdiv(a: int, b: int) -> int:
    return -(-a // b)


# ----------------------------------------------------------------------------- kernels


def _pe_add_from_table_kernel(pe_ref, x_ref, o_ref):
    """Pure broadcast add: pe_ref (block_s, 1, D) f32; x/o (block_s, B, D)."""
    o_ref[...] = x_ref[...] + pe_ref[...].astype(x_ref.dtype)


def _pe_add_sin_kernel(div_ref, phase_ref, x_ref, o_ref):
    """PE computed at (block_s, 1, D) (1/B sins per element) and broadcast over batch."""
    bs, _, d = x_ref.shape
    seq0 = (pl.program_id(0) * bs).astype(jnp.float32)
    pos = lax.broadcasted_iota(jnp.float32, (bs, 1, d), 0) + seq0          # (bs, 1, D)
    pe = jnp.sin(pos * div_ref[...] + phase_ref[...])                      # sin & cos in one pass
    o_ref[...] = x_ref[...] + pe.astype(x_ref.dtype)                       # broadcast over batch


# ----------------------------------------------------------------------------- planning


def _choose_block_s(seq_len: int, x_row_bytes: int) -> int:
    """Pick block_s: ~2 MiB blocks, but enough grid steps for pipelining / 2-TC balance."""
    bs = min(seq_len, max(1, _TARGET_BLOCK_BYTES // x_row_bytes))
    # Max step counts achievable without dropping below the block-size floors.
    steps_1m = seq_len // max(1, _MIN_BLOCK_BYTES // x_row_bytes)
    steps_256k = seq_len // max(1, _SMALL_BLOCK_BYTES // x_row_bytes)
    target = min(_MIN_GRID_STEPS, max(1, steps_1m))
    if steps_256k >= 2:
        target = max(target, 2)        # try to give both v7x TensorCores work
    target = min(target, seq_len)
    if _cdiv(seq_len, bs) < target:
        bs = _cdiv(seq_len, target)
    return max(1, min(bs, seq_len))


def _build_pe_table(S: int, D: int) -> jax.Array:
    """(S, 1, D) f32 PE table, built once in plain JAX (matches the PyTorch buffer)."""
    position = jnp.arange(S, dtype=jnp.float32)[:, None]
    div_term = jnp.exp(
        jnp.arange(0, D, 2, dtype=jnp.float32) * jnp.float32(-math.log(10000.0) / D)
    )
    ang = position * div_term                                   # (S, ceil(D/2))
    pe = jnp.zeros((S, D), jnp.float32)
    pe = pe.at[:, 0::2].set(jnp.sin(ang)[:, : (D + 1) // 2])
    pe = pe.at[:, 1::2].set(jnp.cos(ang)[:, : D // 2])
    return pe.reshape(S, 1, D)


# ----------------------------------------------------------------------------- entry point


def positional_encoding_add(x: jax.Array, *, block_s: int | None = None) -> jax.Array:
    """x: (S, B, D) -> x + sinusoidal PE (matches PositionalEncoding.forward)."""
    S, B, D = x.shape
    itemsize = jnp.dtype(x.dtype).itemsize
    x_row_bytes = B * D * itemsize

    stream_pe = B < _SIN_MIN_B                     # small batch: stream PE table, pure add
    pe_row_bytes = D * 4 if stream_pe else 0       # streamed bytes per sequence row for PE
    # Live VMEM per sequence row: double-buffered x-in + x-out (+ PE operand if streamed).
    buffered_row_bytes = 4 * x_row_bytes + 2 * pe_row_bytes
    const_bytes = 0 if stream_pe else 2 * 2 * D * 4  # tiny double-buffered div/phase rows

    if block_s is None:
        block_s = _choose_block_s(S, x_row_bytes)
    block_s = int(min(int(block_s), S))
    # Clamp so live double-buffered VMEM stays within budget (even for explicit block_s).
    block_s = max(1, min(block_s, max(1, (_VMEM_BUDGET - const_bytes) // max(1, buffered_row_bytes))))

    grid = (_cdiv(S, block_s),)
    vmem_limit = buffered_row_bytes * block_s + const_bytes + (2 << 20)   # + headroom
    vmem_limit = int(min(max(vmem_limit, 4 << 20), _VMEM_BUDGET + (8 << 20)))

    cparams = pltpu.CompilerParams(
        dimension_semantics=("parallel",),
        vmem_limit_bytes=vmem_limit,
    )

    x_spec = pl.BlockSpec((block_s, B, D), lambda i: (i, 0, 0))
    out_shape = jax.ShapeDtypeStruct((S, B, D), x.dtype)

    if stream_pe:
        pe = _build_pe_table(S, D)
        pe_spec = pl.BlockSpec((block_s, 1, D), lambda i: (i, 0, 0))
        return pl.pallas_call(
            _pe_add_from_table_kernel,
            out_shape=out_shape,
            grid_spec=pltpu.PrefetchScalarGridSpec(
                num_scalar_prefetch=0,
                grid=grid,
                in_specs=[pe_spec, x_spec],
                out_specs=x_spec,
            ),
            compiler_params=cparams,
        )(pe, x)

    # Precomputed frequency row and even/odd phase row (cos(a) = sin(a + pi/2)):
    d_idx = jnp.arange(D, dtype=jnp.float32)
    k = jnp.floor(d_idx * 0.5)
    div_feat = jnp.exp(k * jnp.float32(-2.0 * math.log(10000.0) / D)).reshape(1, 1, D)
    phase_feat = ((d_idx - 2.0 * k) * jnp.float32(math.pi / 2.0)).reshape(1, 1, D)
    c_spec = pl.BlockSpec((1, 1, D), lambda i: (0, 0, 0))
    return pl.pallas_call(
        _pe_add_sin_kernel,
        out_shape=out_shape,
        grid_spec=pltpu.PrefetchScalarGridSpec(
            num_scalar_prefetch=0,
            grid=grid,
            in_specs=[c_spec, c_spec, x_spec],
            out_specs=x_spec,
        ),
        compiler_params=cparams,
    )(div_feat, phase_feat, x)


# ----------------------------------------------------------------------------- reference & test


def _reference_pe_add(x: jax.Array) -> jax.Array:
    """Pure-JAX reference mirroring the PyTorch buffer construction."""
    S, B, D = x.shape
    pe = _build_pe_table(S, D)
    return x + pe.astype(x.dtype)


if __name__ == "__main__":
    key = jax.random.PRNGKey(0)

    # Case 1: shapes implied by the module forward (seq=8, batch=2, d_model=32).
    # Small batch -> streamed PE table path (pure broadcast add), single block.
    x1 = jax.random.normal(jax.random.fold_in(key, 0), (8, 2, 32), dtype=jnp.float32)
    out1 = jax.block_until_ready(positional_encoding_add(x1))
    assert out1.shape == x1.shape
    assert jnp.allclose(out1, _reference_pe_add(x1), atol=1e-5, rtol=1e-5), "case 1 mismatch"

    # Case 2: batch >= 4 -> in-kernel batch-amortized sin path, single block.
    x2 = jax.random.normal(jax.random.fold_in(key, 1), (16, 8, 128), dtype=jnp.float32)
    out2 = jax.block_until_ready(positional_encoding_add(x2))
    assert out2.shape == x2.shape
    assert jnp.allclose(out2, _reference_pe_add(x2), atol=1e-5, rtol=1e-5), "case 2 mismatch"

    # Case 3: sin path with multiple grid steps and a ragged last block.
    x3 = jax.random.normal(jax.random.fold_in(key, 2), (13, 4, 64), dtype=jnp.float32)
    out3 = jax.block_until_ready(positional_encoding_add(x3, block_s=4))
    assert out3.shape == x3.shape
    assert jnp.allclose(out3, _reference_pe_add(x3), atol=1e-5, rtol=1e-5), "case 3 mismatch"

    # Case 4: streamed-PE path with multiple grid steps and a ragged last block.
    x4 = jax.random.normal(jax.random.fold_in(key, 3), (10, 2, 32), dtype=jnp.float32)
    out4 = jax.block_until_ready(positional_encoding_add(x4, block_s=3))
    assert out4.shape == x4.shape
    assert jnp.allclose(out4, _reference_pe_add(x4), atol=1e-5, rtol=1e-5), "case 4 mismatch"

    print("KERNEL_OK")
</pallas_src>

<mosaic_0001>
module attributes {stable_mosaic.version = 11 : i64} {
  func.func @_pe_add_from_table_kernel(%arg0: i32, %arg1: memref<8x1x32xf32, #tpu.memory_space<vmem>>, %arg2: memref<8x2x32xf32, #tpu.memory_space<vmem>>, %arg3: memref<8x2x32xf32, #tpu.memory_space<vmem>>) attributes {dimension_semantics = [#tpu.dimension_semantics<parallel>], iteration_bounds = array<i64: 1>, scalar_prefetch = 0 : i64, scratch_operands = 0 : i64, tpu.core_type = #tpu.core_type<tc>, window_params = [{transform_indices = @transform_0, window_bounds = array<i64: 8, 1, 32>}, {transform_indices = @transform_1, window_bounds = array<i64: 8, 2, 32>}, {transform_indices = @transform_2, window_bounds = array<i64: 8, 2, 32>}]} {
    %c0 = arith.constant 0 : index
    %c0_0 = arith.constant 0 : index
    %c0_1 = arith.constant 0 : index
    %0 = vector.load %arg2[%c0, %c0_0, %c0_1] : memref<8x2x32xf32, #tpu.memory_space<vmem>>, vector<8x2x32xf32>
    %c0_2 = arith.constant 0 : index
    %c0_3 = arith.constant 0 : index
    %c0_4 = arith.constant 0 : index
    %1 = vector.load %arg1[%c0_2, %c0_3, %c0_4] : memref<8x1x32xf32, #tpu.memory_space<vmem>>, vector<8x1x32xf32>
    %2 = vector.broadcast %1 : vector<8x1x32xf32> to vector<8x2x32xf32>
    %3 = arith.addf %0, %2 : vector<8x2x32xf32>
    %c0_5 = arith.constant 0 : index
    %c0_6 = arith.constant 0 : index
    %c0_7 = arith.constant 0 : index
    %4 = vector.load %arg3[%c0_5, %c0_6, %c0_7] : memref<8x2x32xf32, #tpu.memory_space<vmem>>, vector<8x2x32xf32>
    tpu.vector_store %arg3[%c0_5, %c0_6, %c0_7], %3 {strides = array<i32>} : memref<8x2x32xf32, #tpu.memory_space<vmem>>, vector<8x2x32xf32>,
    return
  }
  func.func @transform_0(%arg0: i32) -> (i32, i32, i32) {
    %c0_i32 = arith.constant 0 : i32
    %c0_i32_0 = arith.constant 0 : i32
    %c0_i32_1 = arith.constant 0 : i32
    return %arg0, %c0_i32, %c0_i32_0 : i32, i32, i32
  }
  func.func @transform_1(%arg0: i32) -> (i32, i32, i32) {
    %c0_i32 = arith.constant 0 : i32
    %c0_i32_0 = arith.constant 0 : i32
    %c0_i32_1 = arith.constant 0 : i32
    return %arg0, %c0_i32, %c0_i32_0 : i32, i32, i32
  }
  func.func @transform_2(%arg0: i32) -> (i32, i32, i32) {
    %c0_i32 = arith.constant 0 : i32
    %c0_i32_0 = arith.constant 0 : i32
    %c0_i32_1 = arith.constant 0 : i32
    return %arg0, %c0_i32, %c0_i32_0 : i32, i32, i32
  }
}

</mosaic_0001>

<bundles_post_ra>
// kernel: tpu_custom_call.1
= control target key start
LH: loop header
LB: loop body
LE: loop exit
PB: predicated region body
PF: predicated region fallthrough
CT: control target
= control target key end

     0   :  { %7 = vsyncpa [#allocation3], 0  ;;  %s268_s0 = inlined_call_operand.hbm [shape: f32[8,1,32], index: 0, kind: input, shape index: {}]   ;;  %s269_s1 = inlined_call_operand.hbm [shape: f32[8,2,32], index: 1, kind: input, shape index: {}]   ;;  %s270_s2 = inlined_call_operand.hbm [shape: f32[8,2,32], index: 2, kind: output, shape index: {}]  }
   0x1   :  { %8 = vsyncpa [#allocation6], 0 }
   0x2   :  { %9 = vsyncpa [#allocation4], 0  ;;  %s220_s9 = smov [#allocation2]  }
   0x3   :  { %s15_s10 = sshll.u32 %s220_s9, 4  ;;  %s16_s10 = int_to_ptr.vmem [resolvable:$true] %s15_s10 }
   0x4   :  { %s162_s11 = scalar_lea.vmem %s16_s10, 128  ;;  %p167_p1 = scmp.lt.s32.totalorder %s16_s10, %s16_s10 }
   0x5   :  { %p163_p0 = scmp.ne.s32.totalorder %s16_s10, %s162_s11  ;;  %p168_p2 = scmp.lt.s32.totalorder %s162_s11, %s162_s11 }
   0x7   :  { %p169_p3 = por %p168_p2, %p167_p1 }
   0x9   :  { %p170_p4 = pnand %p169_p3, %p163_p0 }
   0xb   :  { %173 = shalt.err (!%p170_p4)
}
   0xc   :  { %s221_s12 = smov 16   ;;  %s222_s13 = smov 1  }
   0xd   :  { %21 = dma.hbm_to_vmem [thread:$0]  %s268_s0, 128, %s16_s10, [#allocation3], %s221_s12, %s221_s12, %s222_s13  }
   0xe   :  { %s223_s16 = smov [#allocation5]  }
   0xf   :  { %s27_s17 = sshll.u32 %s223_s16, 4  ;;  %s28_s17 = int_to_ptr.vmem [resolvable:$true] %s27_s17 }
  0x10   :  { %s182_s18 = scalar_lea.vmem %s28_s17, 256  ;;  %p187_p6 = scmp.lt.s32.totalorder %s28_s17, %s28_s17 }
  0x11   :  { %p183_p5 = scmp.ne.s32.totalorder %s28_s17, %s182_s18  ;;  %p188_p7 = scmp.lt.s32.totalorder %s182_s18, %s182_s18 }
  0x13   :  { %p189_p8 = por %p188_p7, %p187_p6 }
  0x15   :  { %p190_p9 = pnand %p189_p8, %p183_p5 }
  0x17   :  { %193 = shalt.err (!%p190_p9)
}
  0x18   :  { %s224_s19 = smov 32   ;;  %s225_s20 = smov 2  }
  0x19   :  { %33 = dma.hbm_to_vmem [thread:$0]  %s269_s1, 256, %s28_s17, [#allocation6], %s224_s19, %s224_s19, %s225_s20  }
  0x1a   :  { %214 = dma.done.wait [#allocation3], 128  }
  0x1b   :  { %215 = vsyncadd [#allocation3], 4294967168 }
  0x1c   :  { %216 = dma.done.wait [#allocation6], 256  }
  0x1d   :  { %217 = vsyncadd [#allocation6], 4294967040  ;;  %vm112_vm0 = vcmask 254976   ;;  %s226_s0 = smov [#allocation7]   ;;  %v40_v0 = vld [vmem:[#allocation5] sm:$0x3] }
  0x1e   :  { %s251_s23 = sshll.u32 %s226_s0, 4  ;;  %v139_v1 = vld [vmem:[#allocation2] ss:$0 sm:$0xff]  ;;  %v41_v2 = vld [vmem:[#allocation5 + $0x2] sm:$0x3]  ;;  %s127_s23 = int_to_ptr.vmem [resolvable:$true] %s251_s23 }
  0x1f   :  { %v104_v3 = vadd.f32 %v139_v1, %v40_v0  ;;  %v140_v4 = vld [vmem:[#allocation2 + $0x1] ss:$0 sm:$0xff]  ;;  %v42_v5 = vld [vmem:[#allocation5 + $0x4] sm:$0x3]  ;;  %v141_v6 = vld [vmem:[#allocation2 + $0x2] ss:$0 sm:$0xff]  ;;  %p199_p11 = scmp.lt.s32.totalorder %s127_s23, %s127_s23 }
  0x20   :  { %v105_v7 = vadd.f32 %v140_v4, %v41_v2  ;;  %v106_v8 = vadd.f32 %v141_v6, %v42_v5  ;;  %v43_v9 = vld [vmem:[#allocation5 + $0x6] sm:$0x3]  ;;  %v142_v10 = vld [vmem:[#allocation2 + $0x3] ss:$0 sm:$0xff]  ;;  %v44_v11 = vld [vmem:[#allocation5 + $0x8] sm:$0x3] }
  0x21   :  { %113 = vst.msk [vmem:[#allocation7] sm:$0x3] %vm112_vm0, %v104_v3  ;;  %v107_v12 = vadd.f32 %v142_v10, %v43_v9  ;;  %v143_v13 = vld [vmem:[#allocation2 + $0x4] ss:$0 sm:$0xff]  ;;  %v45_v14 = vld [vmem:[#allocation5 + $0xa] sm:$0x3] }
  0x22   :  { %v144_v15 = vld [vmem:[#allocation2 + $0x5] ss:$0 sm:$0xff]  ;;  %114 = vst.msk [vmem:[#allocation7 + $0x2] sm:$0x3] %vm112_vm0, %v105_v7  ;;  %115 = vst.msk [vmem:[#allocation7 + $0x4] sm:$0x3] %vm112_vm0, %v106_v8  ;;  %v108_v16 = vadd.f32 %v143_v13, %v44_v11 }
  0x23   :  { %v109_v17 = vadd.f32 %v144_v15, %v45_v14  ;;  %v46_v18 = vld [vmem:[#allocation5 + $0xc] sm:$0x3]  ;;  %v145_v19 = vld [vmem:[#allocation2 + $0x6] ss:$0 sm:$0xff]  ;;  %v47_v20 = vld [vmem:[#allocation5 + $0xe] sm:$0x3] }
  0x24   :  { %116 = vst.msk [vmem:[#allocation7 + $0x6] sm:$0x3] %vm112_vm0, %v107_v12  ;;  %v110_v21 = vadd.f32 %v145_v19, %v46_v18  ;;  %v146_v22 = vld [vmem:[#allocation2 + $0x7] ss:$0 sm:$0xff]  ;;  %117 = vst.msk [vmem:[#allocation7 + $0x8] sm:$0x3] %vm112_vm0, %v108_v16 }
  0x25   :  { %118 = vst.msk [vmem:[#allocation7 + $0xa] sm:$0x3] %vm112_vm0, %v109_v17  ;;  %v111_v23 = vadd.f32 %v146_v22, %v47_v20  ;;  %s194_s1 = scalar_lea.vmem %s127_s23, 256 }
  0x26   :  { %119 = vst.msk [vmem:[#allocation7 + $0xc] sm:$0x3] %vm112_vm0, %v110_v21  ;;  %p195_p10 = scmp.ne.s32.totalorder %s127_s23, %s194_s1  ;;  %p200_p12 = scmp.lt.s32.totalorder %s194_s1, %s194_s1 }
  0x27   :  { %120 = vst.msk [vmem:[#allocation7 + $0xe] sm:$0x3] %vm112_vm0, %v111_v23 }
  0x28   :  { %p201_p13 = por %p200_p12, %p199_p11 }
  0x2a   :  { %p202_p0 = pnand %p201_p13, %p195_p10 }
  0x2c   :  { %205 = shalt.err (!%p202_p0)
}
  0x2d   :  { %132 = dma.vmem_to_hbm [thread:$0]  %s127_s23, 256, %s270_s2, [#allocation4], %s224_s19, %s224_s19, %s225_s20  }
  0x2e   :  { %218 = dma.done.wait [#allocation4], 256  }
  0x2f   :  { %219 = vsyncadd [#allocation4], 4294967040 }
  0x30   :  { %136 = vsyncpa [#allocation3], 1 }
  0x31   :  { %137 = vsyncpa [#allocation6], 1 }
  0x32   :  { %138 = vsyncpa [#allocation4], 1 }

</bundles_post_ra>
